<compile_context>
chip_gen: v7x
topology: tpu7x:2x2x1
jax: 0.10.0
libtpu: 0.0.40
codegen_flags: <defaults>
</compile_context>

<pallas_src>
import math
import functools

import jax
import jax.numpy as jnp
from jax.experimental import pallas as pl
from jax.experimental.pallas import tpu as pltpu


def _round_up(x, m):
    return ((x + m - 1) // m) * m


def _choose_block_b(B, S, H, itemsize,
                    target_tile_bytes=8 << 20, max_tile_bytes=16 << 20):
    """Pick the batch block size Bb.

    Goal: x tile of a few MiB (double-buffered) so the DMA pipeline runs near the
    HBM roofline, while keeping the (Bb, H) output block sublane-aligned (Bb % 8 == 0).
    """
    per_row = max(1, S * H * itemsize)
    bb = max(1, target_tile_bytes // per_row)
    bb = min(bb, B)
    bb = _round_up(int(bb), 8)
    # Don't blow the per-buffer VMEM budget just because of sublane rounding.
    while bb > 8 and bb * per_row > max_tile_bytes:
        bb -= 8
    # Keep >= 2 grid steps when B is large enough so the "parallel" axis can be
    # sharded across v7x's two TensorCores.
    if bb >= B and B > 16:
        bb = _round_up(-(-B // 2), 8)
    return bb
    # TODO(synk): for very long sequences (S*H*itemsize per row >> 2 MiB) add an
    # S-tiling grid axis with online-softmax accumulators instead of shrinking Bb.


def attentive_reducer_kernel(q_ref, gamma_ref, beta_ref, x_ref, bias_ref, out_ref,
                             *, eps):
    # Per-grid-step views:
    #   q_ref:     (1, H)        attention query (fc.weight / sqrt(H)), x dtype
    #   gamma_ref: (1, H)        LayerNorm scale (f32)
    #   beta_ref:  (1, H)        LayerNorm shift (f32)
    #   x_ref:     (Bb, S, H)    token block, input dtype (f32 or bf16)
    #   bias_ref:  (Bb, 1, S)    additive mask bias (0 keep / -1e9 masked), f32
    #   out_ref:   (Bb, H)       lane-dense output slab
    x = x_ref[...]                                   # (Bb, S, H), native dtype
    bb, _, h = x.shape

    # scores = (q / sqrt(H)) @ x^T  -> (Bb, 1, S), f32 accumulation on the MXU
    q = jnp.broadcast_to(q_ref[...][None], (bb, 1, h)).astype(x.dtype)
    scores = jnp.einsum('boh,bsh->bos', q, x,
                        preferred_element_type=jnp.float32)
    scores = scores + bias_ref[...]                  # masked_fill via additive bias

    # softmax over the sequence axis (f32 statistics)
    scores = scores - jnp.max(scores, axis=-1, keepdims=True)
    p = jnp.exp(scores)
    p = p * pl.reciprocal(jnp.sum(p, axis=-1, keepdims=True), approx=True)

    # weighted sum of values -> (Bb, 1, H), f32 accumulation
    att = jnp.einsum('bos,bsh->boh', p.astype(x.dtype), x,
                     preferred_element_type=jnp.float32)

    # LayerNorm (annotated-transformer style: UNBIASED std (H-1), eps added to std).
    mean = jnp.mean(att, axis=-1, keepdims=True)
    centered = att - mean
    var = jnp.sum(centered * centered, axis=-1, keepdims=True) * (1.0 / (h - 1))
    inv = pl.reciprocal(jnp.sqrt(var) + eps, approx=True)
    normed = gamma_ref[...] * centered * inv + beta_ref[...]      # (Bb, 1, H)

    # TODO(synk): dropout is identity here (inference mode); training-mode dropout
    # would use pltpu.prng_seed / pltpu.stateful_bernoulli.
    out_ref[...] = normed[:, 0, :].astype(out_ref.dtype)


def attentive_reducer(batch_token_emb, masks, fc_weight, ln_gamma, ln_beta,
                      *, keepdim=False, eps=1e-6, block_b=None):
    """Pallas implementation of AttentiveReducer.forward (eval mode).

    batch_token_emb: (B, S, H) in f32 or bf16 (kept in its own dtype on the HBM path)
    masks:           (B, S) or None
    """
    B, S, H = batch_token_emb.shape
    dtype = batch_token_emb.dtype
    itemsize = jnp.dtype(dtype).itemsize

    bb = block_b if block_b is not None else _choose_block_b(B, S, H, itemsize)
    grid_b = pl.cdiv(B, bb)
    B_pad = grid_b * bb

    # Additive mask bias: 0 where kept, -1e9 where masked (bit-equivalent to
    # masked_fill for O(1) scores at f32 resolution around 1e9).
    if masks is None:
        bias = jnp.zeros((B, 1, S), dtype=jnp.float32)
    else:
        bias = jnp.where(masks.reshape(B, S) == 0,
                         jnp.float32(-1e9), jnp.float32(0.0)).reshape(B, 1, S)

    x = batch_token_emb
    if B_pad != B:
        x = jnp.pad(x, ((0, B_pad - B), (0, 0), (0, 0)))
        bias = jnp.pad(bias, ((0, B_pad - B), (0, 0), (0, 0)))

    # Fold the 1/sqrt(H) attention scale into the query weight once (wrapper-side).
    qw = (fc_weight.reshape(1, H) / math.sqrt(H)).astype(dtype)
    g = ln_gamma.reshape(1, H).astype(jnp.float32)
    b = ln_beta.reshape(1, H).astype(jnp.float32)

    kernel = functools.partial(attentive_reducer_kernel, eps=eps)

    out = pl.pallas_call(
        kernel,
        out_shape=jax.ShapeDtypeStruct((B_pad, H), dtype),
        grid=(grid_b,),
        in_specs=[
            pl.BlockSpec((1, H), lambda i: (0, 0)),          # query weight (pre-scaled)
            pl.BlockSpec((1, H), lambda i: (0, 0)),          # layer-norm gamma
            pl.BlockSpec((1, H), lambda i: (0, 0)),          # layer-norm beta
            pl.BlockSpec((bb, S, H), lambda i: (i, 0, 0)),   # tokens, Bb batches / step
            pl.BlockSpec((bb, 1, S), lambda i: (i, 0, 0)),   # additive mask bias
        ],
        out_specs=pl.BlockSpec((bb, H), lambda i: (i, 0)),   # lane-dense output slab
        compiler_params=pltpu.CompilerParams(
            dimension_semantics=("parallel",),
            vmem_limit_bytes=48 << 20,   # above scoped defaults, below v7x 64 MiB
        ),
    )(qw, g, b, x, bias)

    out = out[:B]
    if keepdim:
        return out[:, None, :]          # (B, 1, H)
    return out                          # (B, H)  == squeeze(-2)


def _reference(batch_token_emb, masks, fc_weight, ln_gamma, ln_beta, eps=1e-6):
    """Pure-JAX reference mirroring the PyTorch module (eval mode)."""
    B, S, H = batch_token_emb.shape
    x = batch_token_emb.astype(jnp.float32)
    q = fc_weight.reshape(1, H).astype(jnp.float32)
    scores = jnp.einsum('oh,bsh->bos', q, x) / math.sqrt(H)             # (B,1,S)
    if masks is not None:
        scores = jnp.where(masks.reshape(B, 1, S) == 0, -1e9, scores)
    p = jax.nn.softmax(scores, axis=-1)
    att = jnp.einsum('bos,bsh->boh', p, x)                              # (B,1,H)
    mean = jnp.mean(att, axis=-1, keepdims=True)
    centered = att - mean
    std = jnp.sqrt(jnp.sum(centered ** 2, axis=-1, keepdims=True) / (H - 1))
    out = ln_gamma * centered / (std + eps) + ln_beta
    return out.reshape(B, H)


if __name__ == "__main__":
    B, S, H = 2, 8, 32
    key = jax.random.PRNGKey(0)
    kx, kw, km = jax.random.split(key, 3)

    x = jax.random.normal(kx, (B, S, H), dtype=jnp.float32)
    # nn.Linear(H, 1, bias=False).weight has shape (1, H); deterministic init:
    fc_weight = jax.random.normal(kw, (1, H), dtype=jnp.float32) / math.sqrt(H)
    ln_gamma = jnp.ones((H,), dtype=jnp.float32)   # LayerNorm a_2
    ln_beta = jnp.zeros((H,), dtype=jnp.float32)   # LayerNorm b_2
    # mask out the last two tokens of batch element 1
    masks = jnp.ones((B, S), dtype=jnp.float32).at[1, -2:].set(0.0)

    out = attentive_reducer(x, masks, fc_weight, ln_gamma, ln_beta, keepdim=False)
    out = jax.block_until_ready(out)
    ref = _reference(x, masks, fc_weight, ln_gamma, ln_beta)
    assert out.shape == (B, H), out.shape
    # Tolerance loosened vs all-exact path: pl.reciprocal(approx=True) in softmax
    # denominator and LN 1/(std+eps).
    assert jnp.allclose(out, ref, atol=3e-2, rtol=3e-2), (
        f"max abs err {jnp.max(jnp.abs(out - ref))}")

    # keepdim path + no-mask path (also exercises batch padding to the block size)
    out_k = attentive_reducer(x, None, fc_weight, ln_gamma, ln_beta, keepdim=True)
    out_k = jax.block_until_ready(out_k)
    ref_k = _reference(x, None, fc_weight, ln_gamma, ln_beta)
    assert out_k.shape == (B, 1, H), out_k.shape
    assert jnp.allclose(out_k.reshape(B, H), ref_k, atol=3e-2, rtol=3e-2), (
        f"max abs err {jnp.max(jnp.abs(out_k.reshape(B, H) - ref_k))}")

    print("KERNEL_OK")
</pallas_src>

<mosaic_0001>
module attributes {stable_mosaic.version = 11 : i64} {
  func.func @attentive_reducer_kernel(%arg0: i32, %arg1: memref<1x32xf32, #tpu.memory_space<vmem>>, %arg2: memref<1x32xf32, #tpu.memory_space<vmem>>, %arg3: memref<1x32xf32, #tpu.memory_space<vmem>>, %arg4: memref<8x8x32xf32, #tpu.memory_space<vmem>>, %arg5: memref<8x1x8xf32, #tpu.memory_space<vmem>>, %arg6: memref<8x32xf32, #tpu.memory_space<vmem>>) attributes {dimension_semantics = [#tpu.dimension_semantics<parallel>], iteration_bounds = array<i64: 1>, scalar_prefetch = 0 : i64, scratch_operands = 0 : i64, tpu.core_type = #tpu.core_type<tc>, window_params = [{pipeline_mode = #tpu.pipeline_mode<synchronous>, transform_indices = @transform_0, window_bounds = array<i64: 1, 32>}, {pipeline_mode = #tpu.pipeline_mode<synchronous>, transform_indices = @transform_1, window_bounds = array<i64: 1, 32>}, {pipeline_mode = #tpu.pipeline_mode<synchronous>, transform_indices = @transform_2, window_bounds = array<i64: 1, 32>}, {transform_indices = @transform_3, window_bounds = array<i64: 8, 8, 32>}, {transform_indices = @transform_4, window_bounds = array<i64: 8, 1, 8>}, {transform_indices = @transform_5, window_bounds = array<i64: 8, 32>}]} {
    %c0 = arith.constant 0 : index
    %c0_0 = arith.constant 0 : index
    %c0_1 = arith.constant 0 : index
    %0 = vector.load %arg4[%c0, %c0_0, %c0_1] : memref<8x8x32xf32, #tpu.memory_space<vmem>>, vector<8x8x32xf32>
    %c0_2 = arith.constant 0 : index
    %c0_3 = arith.constant 0 : index
    %1 = vector.load %arg1[%c0_2, %c0_3] : memref<1x32xf32, #tpu.memory_space<vmem>>, vector<1x32xf32>
    %2 = vector.shape_cast %1 : vector<1x32xf32> to vector<1x1x32xf32>
    %3 = vector.shape_cast %2 : vector<1x1x32xf32> to vector<1x1x32xf32>
    %4 = vector.broadcast %3 : vector<1x1x32xf32> to vector<8x1x32xf32>
    "tpu.trace_start"() <{level = 10 : i32, message = "boh,bsh->bos"}> : () -> ()
    %cst = arith.constant dense<0.000000e+00> : vector<8x1x8xf32>
    %5 = tpu.matmul %4, %0, %cst {dimension_numbers = #tpu.dot_dimension_numbers<[2], [2], [1], [1], [0, 0, 0, 1, 1, 1], [0], [0]>} : vector<8x1x32xf32>, vector<8x8x32xf32>, vector<8x1x8xf32> -> vector<8x1x8xf32>
    "tpu.trace_stop"() : () -> ()
    %c0_4 = arith.constant 0 : index
    %c0_5 = arith.constant 0 : index
    %c0_6 = arith.constant 0 : index
    %6 = vector.load %arg5[%c0_4, %c0_5, %c0_6] : memref<8x1x8xf32, #tpu.memory_space<vmem>>, vector<8x1x8xf32>
    %7 = arith.addf %5, %6 : vector<8x1x8xf32>
    %cst_7 = arith.constant dense<0xFF800000> : vector<8x1xf32>
    %8 = vector.multi_reduction <maximumf>, %7, %cst_7 [2] : vector<8x1x8xf32> to vector<8x1xf32>
    %9 = vector.shape_cast %8 : vector<8x1xf32> to vector<8x1x1xf32>
    %10 = vector.broadcast %9 : vector<8x1x1xf32> to vector<8x1x8xf32>
    %11 = arith.subf %7, %10 : vector<8x1x8xf32>
    %12 = math.exp %11 : vector<8x1x8xf32>
    %cst_8 = arith.constant dense<0.000000e+00> : vector<8x1xf32>
    %13 = vector.multi_reduction <add>, %12, %cst_8 [2] : vector<8x1x8xf32> to vector<8x1xf32>
    %14 = vector.shape_cast %13 : vector<8x1xf32> to vector<8x1x1xf32>
    %15 = tpu.reciprocal %14 {approx = true} : vector<8x1x1xf32> -> vector<8x1x1xf32>
    %16 = vector.broadcast %15 : vector<8x1x1xf32> to vector<8x1x8xf32>
    %17 = arith.mulf %12, %16 : vector<8x1x8xf32>
    "tpu.trace_start"() <{level = 10 : i32, message = "bos,bsh->boh"}> : () -> ()
    %cst_9 = arith.constant dense<0.000000e+00> : vector<8x1x32xf32>
    %18 = tpu.matmul %17, %0, %cst_9 {dimension_numbers = #tpu.dot_dimension_numbers<[2], [1], [1], [2], [0, 0, 0, 1, 1, 2], [0], [0]>} : vector<8x1x8xf32>, vector<8x8x32xf32>, vector<8x1x32xf32> -> vector<8x1x32xf32>
    "tpu.trace_stop"() : () -> ()
    %cst_10 = arith.constant dense<0.000000e+00> : vector<8x1xf32>
    %19 = vector.multi_reduction <add>, %18, %cst_10 [2] : vector<8x1x32xf32> to vector<8x1xf32>
    %20 = vector.shape_cast %19 : vector<8x1xf32> to vector<8x1x1xf32>
    %cst_11 = arith.constant 3.200000e+01 : f32
    %21 = vector.broadcast %cst_11 : f32 to vector<8x1x1xf32>
    %22 = arith.divf %20, %21 : vector<8x1x1xf32>
    %23 = vector.broadcast %22 : vector<8x1x1xf32> to vector<8x1x32xf32>
    %24 = arith.subf %18, %23 : vector<8x1x32xf32>
    %25 = arith.mulf %24, %24 : vector<8x1x32xf32>
    %cst_12 = arith.constant dense<0.000000e+00> : vector<8x1xf32>
    %26 = vector.multi_reduction <add>, %25, %cst_12 [2] : vector<8x1x32xf32> to vector<8x1xf32>
    %27 = vector.shape_cast %26 : vector<8x1xf32> to vector<8x1x1xf32>
    %cst_13 = arith.constant 0.0322580636 : f32
    %28 = vector.broadcast %cst_13 : f32 to vector<8x1x1xf32>
    %29 = arith.mulf %27, %28 : vector<8x1x1xf32>
    %30 = math.sqrt %29 : vector<8x1x1xf32>
    %cst_14 = arith.constant 9.99999997E-7 : f32
    %31 = vector.broadcast %cst_14 : f32 to vector<8x1x1xf32>
    %32 = arith.addf %30, %31 : vector<8x1x1xf32>
    %33 = tpu.reciprocal %32 {approx = true} : vector<8x1x1xf32> -> vector<8x1x1xf32>
    %c0_15 = arith.constant 0 : index
    %c0_16 = arith.constant 0 : index
    %34 = vector.load %arg2[%c0_15, %c0_16] : memref<1x32xf32, #tpu.memory_space<vmem>>, vector<1x32xf32>
    %35 = vector.shape_cast %34 : vector<1x32xf32> to vector<1x1x32xf32>
    %36 = vector.broadcast %35 : vector<1x1x32xf32> to vector<8x1x32xf32>
    %37 = arith.mulf %36, %24 : vector<8x1x32xf32>
    %38 = vector.broadcast %33 : vector<8x1x1xf32> to vector<8x1x32xf32>
    %39 = arith.mulf %37, %38 : vector<8x1x32xf32>
    %c0_17 = arith.constant 0 : index
    %c0_18 = arith.constant 0 : index
    %40 = vector.load %arg3[%c0_17, %c0_18] : memref<1x32xf32, #tpu.memory_space<vmem>>, vector<1x32xf32>
    %41 = vector.shape_cast %40 : vector<1x32xf32> to vector<1x1x32xf32>
    %42 = vector.broadcast %41 : vector<1x1x32xf32> to vector<8x1x32xf32>
    %43 = arith.addf %39, %42 : vector<8x1x32xf32>
    %44 = vector.shape_cast %43 : vector<8x1x32xf32> to vector<8x32xf32>
    %c0_19 = arith.constant 0 : index
    %c0_20 = arith.constant 0 : index
    %45 = vector.load %arg6[%c0_19, %c0_20] : memref<8x32xf32, #tpu.memory_space<vmem>>, vector<8x32xf32>
    tpu.vector_store %arg6[%c0_19, %c0_20], %44 {strides = array<i32>} : memref<8x32xf32, #tpu.memory_space<vmem>>, vector<8x32xf32>,
    return
  }
  func.func @transform_0(%arg0: i32) -> (i32, i32) {
    %c0_i32 = arith.constant 0 : i32
    %c0_i32_0 = arith.constant 0 : i32
    %c0_i32_1 = arith.constant 0 : i32
    return %c0_i32, %c0_i32_0 : i32, i32
  }
  func.func @transform_1(%arg0: i32) -> (i32, i32) {
    %c0_i32 = arith.constant 0 : i32
    %c0_i32_0 = arith.constant 0 : i32
    %c0_i32_1 = arith.constant 0 : i32
    return %c0_i32, %c0_i32_0 : i32, i32
  }
  func.func @transform_2(%arg0: i32) -> (i32, i32) {
    %c0_i32 = arith.constant 0 : i32
    %c0_i32_0 = arith.constant 0 : i32
    %c0_i32_1 = arith.constant 0 : i32
    return %c0_i32, %c0_i32_0 : i32, i32
  }
  func.func @transform_3(%arg0: i32) -> (i32, i32, i32) {
    %c0_i32 = arith.constant 0 : i32
    %c0_i32_0 = arith.constant 0 : i32
    %c0_i32_1 = arith.constant 0 : i32
    return %arg0, %c0_i32, %c0_i32_0 : i32, i32, i32
  }
  func.func @transform_4(%arg0: i32) -> (i32, i32, i32) {
    %c0_i32 = arith.constant 0 : i32
    %c0_i32_0 = arith.constant 0 : i32
    %c0_i32_1 = arith.constant 0 : i32
    return %arg0, %c0_i32, %c0_i32_0 : i32, i32, i32
  }
  func.func @transform_5(%arg0: i32) -> (i32, i32) {
    %c0_i32 = arith.constant 0 : i32
    %c0_i32_0 = arith.constant 0 : i32
    return %arg0, %c0_i32 : i32, i32
  }
}

</mosaic_0001>

<bundles_post_ra>
// kernel: tpu_custom_call.1
= control target key start
LH: loop header
LB: loop body
LE: loop exit
PB: predicated region body
PF: predicated region fallthrough
CT: control target
= control target key end

     0   :  { %10 = vsyncpa [#allocation3], 0  ;;  %s2165_s0 = inlined_call_operand.hbm [shape: f32[1,32], index: 0, kind: input, shape index: {}]   ;;  %s2166_s1 = inlined_call_operand.vmem [shape: f32[1,32], index: 1, kind: input, shape index: {}]   ;;  %s2167_s2 = inlined_call_operand.vmem [shape: f32[1,32], index: 2, kind: input, shape index: {}]   ;;  %s2168_s3 = inlined_call_operand.hbm [shape: f32[8,8,32], index: 3, kind: input, shape index: {}]   ;;  %s2169_s4 = inlined_call_operand.vmem [shape: f32[8,1,8], index: 4, kind: input, shape index: {}]   ;;  %s2170_s5 = inlined_call_operand.hbm [shape: f32[8,32], index: 5, kind: output, shape index: {}]  }
   0x1   :  { %11 = vsyncpa [#allocation6], 0 }
   0x2   :  { %12 = vsyncpa [#allocation4], 0  ;;  %s1861_s18 = smov [#allocation2]   ;;  %s1862_s20 = smov [#allocation5]  }
   0x3   :  { %s19_s19 = sshll.u32 %s1861_s18, 4  ;;  %s32_s21 = sshll.u32 %s1862_s20, 4  ;;  %s20_s19 = int_to_ptr.vmem [resolvable:$true] %s19_s19  ;;  %s1899_s21 = int_to_ptr.vmem [resolvable:$true] %s32_s21 }
   0x4   :  { %s1789_s24 = scalar_lea.hbm %s2165_s0, 16 }
   0x5   :  { %p1790_p0 = scmp.ne.s32.totalorder %s2165_s0, %s1789_s24  ;;  %p1793_p1 = scmp.lt.u32.totalorder %s1789_s24, %s2165_s0 }
   0x7   :  { %p1795_p2 = pnand %p1793_p1, %p1790_p0 }
   0x9   :  { %1798 = shalt.err (!%p1795_p2)
}
   0xa   :  { %s1799_s29 = scalar_lea.vmem %s20_s19, 16  ;;  %s1803_s30 = scalar_lea.vmem %s20_s19, 32 }
   0xb   :  { %p1800_p3 = scmp.ne.s32.totalorder %s20_s19, %s1799_s29  ;;  %p1804_p4 = scmp.lt.s32.totalorder %s20_s19, %s20_s19 }
   0xc   :  { %p1805_p5 = scmp.lt.s32.totalorder %s1803_s30, %s1799_s29 }
   0xe   :  { %p1806_p6 = por %p1805_p5, %p1804_p4 }
  0x10   :  { %p1807_p7 = pnand %p1806_p6, %p1800_p3 }
  0x12   :  { %1810 = shalt.err (!%p1807_p7)
}
  0x13   :  { %22 = dma.hbm_to_vmem [thread:$0]  %s2165_s0, 16, %s20_s19, [#allocation3]  }
  0x14   :  { %s1811_s10 = scalar_lea.hbm %s2168_s3, 1024 }
  0x15   :  { %p1812_p8 = scmp.ne.s32.totalorder %s2168_s3, %s1811_s10  ;;  %p1815_p9 = scmp.lt.u32.totalorder %s1811_s10, %s2168_s3 }
  0x17   :  { %p1817_p10 = pnand %p1815_p9, %p1812_p8 }
  0x19   :  { %1820 = shalt.err (!%p1817_p10)
}
  0x1a   :  { %s1821_s15 = scalar_lea.vmem %s1899_s21, 1024  ;;  %p1826_p12 = scmp.lt.s32.totalorder %s1899_s21, %s1899_s21 }
  0x1b   :  { %p1822_p11 = scmp.ne.s32.totalorder %s1899_s21, %s1821_s15  ;;  %p1827_p13 = scmp.lt.s32.totalorder %s1821_s15, %s1821_s15 }
  0x1d   :  { %p1828_p0 = por %p1827_p13, %p1826_p12 }
  0x1f   :  { %p1829_p1 = pnand %p1828_p0, %p1822_p11 }
  0x21   :  { %1832 = shalt.err (!%p1829_p1)
}
  0x22   :  { %s1863_s0 = smov 128   ;;  %s1864_s16 = smov 8  }
  0x23   :  { %38 = dma.hbm_to_vmem [thread:$0]  %s2168_s3, 1024, %s1899_s21, [#allocation6], %s1863_s0, %s1863_s0, %s1864_s16  }
  0x24   :  { %1855 = dma.done.wait [#allocation3], 16  }
  0x25   :  { %1856 = vsyncadd [#allocation3], 4294967280 }
  0x26   :  { %1857 = dma.done.wait [#allocation6], 1024  }
  0x27   :  { %1858 = vsyncadd [#allocation6], 4294966272  ;;  %v1865_v0 = vmov 0.0   ;;  %vm1866_vm0 = vmmov 0   ;;  %vm64_vm1 = vcmask 261120   ;;  %v47_v1 = vld [vmem:[#allocation5] sm:$0xff] }
  0x28   :  { %1637 = vmatprep.subr.mxu0 %v1865_v0  ;;  %1639 = vmatprep.mubr.msk.f32.mxu0 %vm1866_vm0, %v1865_v0  ;;  %v48_v2 = vld [vmem:[#allocation5 + $0x8] sm:$0xff]  ;;  %v55_v3 = vld [vmem:[#allocation2] sm:$0x1]  ;;  %v1939_v4 = vld [vmem:[#allocation5 + $0x10] sm:$0xff]  ;;  %vm652_vm2 = vcmask 57344   ;;  %vm741_vm3 = vcmask 64512  }
  0x29   :  { %1642 = vmatprep.subr.mxu1 %v1865_v0  ;;  %1644 = vmatprep.mubr.msk.f32.mxu1 %vm1866_vm0, %v1865_v0  ;;  %v1942_v5 = vld [vmem:[#allocation5 + $0x18] sm:$0xff]  ;;  %v1953_v6 = vld [vmem:[#allocation5 + $0x20] sm:$0xff]  ;;  %v1959_v7 = vld [vmem:[#allocation5 + $0x28] sm:$0xff]  ;;  %vm1326_vm4 = vcmask 253952  }
  0x2a   :  { %1638 = vmatpush3.xpose.msk.msra.mxu0 %vm64_vm1, %v47_v1  ;;  %1643 = vmatpush3.xpose.msk.msra.mxu1 %vm64_vm1, %v48_v2  ;;  %v1967_v8 = vld [vmem:[#allocation5 + $0x30] sm:$0xff]  ;;  %v1975_v9 = vld [vmem:[#allocation5 + $0x38] sm:$0xff] }
  0x2b   :  { %1647 = vmatprep.subr.mxu0 %v1865_v0  ;;  %1652 = vmatprep.subr.mxu1 %v1865_v0  ;;  %v56_v10 = vld [vmem:[%s2169_s4] sm:$0x1]  ;;  %v57_v11 = vld [vmem:[%s2169_s4 + $0x1] sm:$0x1]  ;;  %v58_v18 = vld [vmem:[%s2169_s4 + $0x2] sm:$0x1] }
  0x2c   :  { %v59_v21 = vld [vmem:[%s2169_s4 + $0x3] sm:$0x1]  ;;  %v60_v26 = vld [vmem:[%s2169_s4 + $0x4] sm:$0x1]  ;;  %v61_v31 = vld [vmem:[%s2169_s4 + $0x5] sm:$0x1] }
  0x2d   :  { %1640 = vmatmul.mubr.msk.f32.vlgmr.msra.gmra.mrb[0].mxu0 %vm64_vm1, %v55_v3  ;;  %1645 = vmatmul.mubr.msk.f32.vlgmr.msra.gmra.mrb[0].mxu1 %vm64_vm1, %v55_v3  ;;  %v62_v36 = vld [vmem:[%s2169_s4 + $0x6] sm:$0x1]  ;;  %v63_v41 = vld [vmem:[%s2169_s4 + $0x7] sm:$0x1] }
  0x2e   :  { %1648 = vmatpush3.xpose.msk.msra.mxu0 %vm64_vm1, %v1939_v4  ;;  %1649 = vmatprep.mubr.msk.f32.mxu0 %vm1866_vm0, %v1865_v0 }
  0x2f   :  { %1657 = vmatprep.subr.mxu0 %v1865_v0  ;;  %1653 = vmatpush3.xpose.msk.msra.mxu1 %vm64_vm1, %v1942_v5 }
  0x30   :  { %1654 = vmatprep.mubr.msk.f32.mxu1 %vm1866_vm0, %v1865_v0  ;;  %1662 = vmatprep.subr.mxu1 %v1865_v0 }
  0x31   :  { %1650 = vmatmul.mubr.msk.f32.vlgmr.msra.gmra.mrb[2].mxu0 %vm64_vm1, %v55_v3 }
  0x32   :  { %1658 = vmatpush3.xpose.msk.msra.mxu0 %vm64_vm1, %v1953_v6  ;;  %1659 = vmatprep.mubr.msk.f32.mxu0 %vm1866_vm0, %v1865_v0 }
  0x33   :  { %1655 = vmatmul.mubr.msk.f32.vlgmr.msra.gmra.mrb[2].mxu1 %vm64_vm1, %v55_v3  ;;  %1667 = vmatprep.subr.mxu0 %v1865_v0 }
  0x34   :  { %1663 = vmatpush3.xpose.msk.msra.mxu1 %vm64_vm1, %v1959_v7  ;;  %1664 = vmatprep.mubr.msk.f32.mxu1 %vm1866_vm0, %v1865_v0 }
  0x35   :  { %1660 = vmatmul.mubr.msk.f32.vlgmr.msra.gmra.mrb[4].mxu0 %vm64_vm1, %v55_v3  ;;  %1672 = vmatprep.subr.mxu1 %v1865_v0 }
  0x36   :  { %1668 = vmatpush3.xpose.msk.msra.mxu0 %vm64_vm1, %v1967_v8  ;;  %1669 = vmatprep.mubr.msk.f32.mxu0 %vm1866_vm0, %v1865_v0 }
  0x37   :  { %1665 = vmatmul.mubr.msk.f32.vlgmr.msra.gmra.mrb[4].mxu1 %vm64_vm1, %v55_v3  ;;  %1677 = vmatprep.subr.mxu0 %v1865_v0 }
  0x38   :  { %1673 = vmatpush3.xpose.msk.msra.mxu1 %vm64_vm1, %v1975_v9  ;;  %1674 = vmatprep.mubr.msk.f32.mxu1 %vm1866_vm0, %v1865_v0 }
  0x39   :  { %1670 = vmatmul.mubr.msk.f32.vlgmr.msra.gmra.mrb[6].mxu0 %vm64_vm1, %v55_v3  ;;  %1682 = vmatprep.subr.mxu1 %v1865_v0 }
  0x3a   :  { %1678 = vmatpush3.msra.mxu0 %v47_v1  ;;  %1679 = vmatprep.mubr.msk.f32.mxu0 %vm1866_vm0, %v1865_v0 }
  0x3b   :  { %1675 = vmatmul.mubr.msk.f32.vlgmr.msra.gmra.mrb[6].mxu1 %vm64_vm1, %v55_v3  ;;  %1687 = vmatprep.subr.mxu0 %v1865_v0 }
  0x3c   :  { %1683 = vmatpush3.msra.mxu1 %v48_v2  ;;  %1684 = vmatprep.mubr.msk.f32.mxu1 %vm1866_vm0, %v1865_v0 }
  0x3d   :  { %1692 = vmatprep.subr.mxu1 %v1865_v0 }
 0x100   :  { %v137_v12 = vpop.f32.mrb[0].mxu0  ;;  %v210_v13 = vpop.f32.mrb[0].mxu1 }
 0x101   :  { %v138_v14 = vadd.f32 %v137_v12, %v56_v10  ;;  %v1641_v15 = vpop.f32.mrb[1].mxu0  ;;  %v211_v16 = vadd.f32 %v210_v13, %v57_v11  ;;  %v1646_v17 = vpop.f32.mrb[1].mxu1 }
 0x103   :  { %v653_v19 = vsel %vm652_vm2, %v138_v14, -inf  ;;  %v656_v24 = vsel %vm652_vm2, %v211_v16, -inf }
 0x104   :  { %654 = vmax.xlane.f32.xlu0 %v653_v19  ;;  %v283_v20 = vpop.f32.mrb[2].mxu0 }
 0x105   :  { %v284_v22 = vadd.f32 %v283_v20, %v58_v18  ;;  %v1651_v23 = vpop.f32.mrb[3].mxu0 }
 0x106   :  { %v356_v25 = vpop.f32.mrb[2].mxu1 }
 0x107   :  { %v357_v27 = vadd.f32 %v356_v25, %v59_v21  ;;  %v659_v28 = vsel %vm652_vm2, %v284_v22, -inf  ;;  %v1656_v29 = vpop.f32.mrb[3].mxu1 }
 0x108   :  { %657 = vmax.xlane.f32.xlu0 %v656_v24  ;;  %660 = vmax.xlane.f32.xlu1 %v659_v28  ;;  %v429_v30 = vpop.f32.mrb[4].mxu0 }
 0x109   :  { %v430_v32 = vadd.f32 %v429_v30, %v60_v26  ;;  %v1661_v33 = vpop.f32.mrb[5].mxu0  ;;  %v662_v34 = vsel %vm652_vm2, %v357_v27, -inf }
 0x10a   :  { %v502_v35 = vpop.f32.mrb[4].mxu1 }
 0x10b   :  { %v503_v37 = vadd.f32 %v502_v35, %v61_v31  ;;  %v665_v38 = vsel %vm652_vm2, %v430_v32, -inf  ;;  %v1666_v39 = vpop.f32.mrb[5].mxu1 }
 0x10c   :  { %663 = vmax.xlane.f32.xlu1 %v662_v34  ;;  %666 = vmax.xlane.f32.xlu0 %v665_v38  ;;  %v575_v40 = vpop.f32.mrb[6].mxu0 }
 0x10d   :  { %v576_v42 = vadd.f32 %v575_v40, %v62_v36  ;;  %v668_v43 = vsel %vm652_vm2, %v503_v37, -inf  ;;  %v1671_v44 = vpop.f32.mrb[7].mxu0 }
 0x10e   :  { %v648_v45 = vpop.f32.mrb[6].mxu1 }
 0x10f   :  { %v649_v46 = vadd.f32 %v648_v45, %v63_v41  ;;  %v671_v47 = vsel %vm652_vm2, %v576_v42, -inf  ;;  %v1676_v48 = vpop.f32.mrb[7].mxu1 }
 0x110   :  { %669 = vmax.xlane.f32.xlu1 %v668_v43  ;;  %672 = vmax.xlane.f32.xlu0 %v671_v47 }
 0x111   :  { %v674_v49 = vsel %vm652_vm2, %v649_v46, -inf }
 0x114   :  { %675 = vmax.xlane.f32.xlu1 %v674_v49 }
 0x191   :  { %v655_v50 = vpop.xlane.xlu0 %654 }
 0x192   :  { %v677_v51 = vsub.f32 %v138_v14, %v655_v50 }
 0x194   :  { %v685_v52 = vmul.f32 1.442695, %v677_v51 }
 0x195   :  { %v658_v53 = vpop.xlane.xlu0 %657  ;;  %v661_v54 = vpop.xlane.xlu1 %660 }
 0x196   :  { %1725 = vpow2.f32 %v685_v52  ;;  %v678_v55 = vsub.f32 %v211_v16, %v658_v53  ;;  %v679_v56 = vsub.f32 %v284_v22, %v661_v54 }
 0x198   :  { %v687_v57 = vmul.f32 1.442695, %v678_v55  ;;  %v689_v58 = vmul.f32 1.442695, %v679_v56 }
 0x199   :  { %v664_v59 = vpop.xlane.xlu1 %663  ;;  %v667_v60 = vpop.xlane.xlu0 %666 }
 0x19a   :  { %1727 = vpow2.f32 %v687_v57  ;;  %v680_v61 = vsub.f32 %v357_v27, %v664_v59  ;;  %v681_v62 = vsub.f32 %v430_v32, %v667_v60 }
 0x19b   :  { %1729 = vpow2.f32 %v689_v58 }
 0x19c   :  { %v691_v63 = vmul.f32 1.442695, %v680_v61  ;;  %v693_v1 = vmul.f32 1.442695, %v681_v62 }
 0x19d   :  { %v670_v2 = vpop.xlane.xlu1 %669  ;;  %v673_v3 = vpop.xlane.xlu0 %672 }
 0x19e   :  { %1731 = vpow2.f32 %v691_v63  ;;  %v682_v10 = vsub.f32 %v503_v37, %v670_v2  ;;  %v683_v11 = vsub.f32 %v576_v42, %v673_v3 }
 0x19f   :  { %1733 = vpow2.f32 %v693_v1 }
 0x1a0   :  { %v1726_v12 = vpop.eup %1725  ;;  %v695_v13 = vmul.f32 1.442695, %v682_v10  ;;  %v697_v14 = vmul.f32 1.442695, %v683_v11 }
 0x1a1   :  { %v676_v15 = vpop.xlane.xlu1 %675  ;;  %v701_v16 = vsel %vm652_vm2, %v1726_v12, 0.0 }
 0x1a2   :  { %1735 = vpow2.f32 %v695_v13  ;;  %v684_v17 = vsub.f32 %v649_v46, %v676_v15  ;;  %702 = vadd.xlane.f32.xlu0 %v701_v16 }
 0x1a3   :  { %1737 = vpow2.f32 %v697_v14 }
 0x1a4   :  { %v1728_v18 = vpop.eup %1727  ;;  %v699_v19 = vmul.f32 1.442695, %v684_v17 }
 0x1a5   :  { %v1730_v20 = vpop.eup %1729  ;;  %v704_v21 = vsel %vm652_vm2, %v1728_v18, 0.0 }
 0x1a6   :  { %1739 = vpow2.f32 %v699_v19  ;;  %705 = vadd.xlane.f32.xlu1 %v704_v21  ;;  %v707_v22 = vsel %vm652_vm2, %v1730_v20, 0.0 }
 0x1a7   :  { %708 = vadd.xlane.f32.xlu0 %v707_v22 }
 0x1a8   :  { %v1732_v23 = vpop.eup %1731 }
 0x1a9   :  { %v1734_v24 = vpop.eup %1733  ;;  %v710_v25 = vsel %vm652_vm2, %v1732_v23, 0.0 }
 0x1aa   :  { %711 = vadd.xlane.f32.xlu1 %v710_v25  ;;  %v713_v26 = vsel %vm652_vm2, %v1734_v24, 0.0 }
 0x1ab   :  { %714 = vadd.xlane.f32.xlu0 %v713_v26 }
 0x1ac   :  { %v1736_v27 = vpop.eup %1735 }
 0x1ad   :  { %v1738_v28 = vpop.eup %1737  ;;  %v716_v29 = vsel %vm652_vm2, %v1736_v27, 0.0 }
 0x1ae   :  { %717 = vadd.xlane.f32.xlu1 %v716_v29  ;;  %v719_v30 = vsel %vm652_vm2, %v1738_v28, 0.0 }
 0x1af   :  { %720 = vadd.xlane.f32.xlu0 %v719_v30 }
 0x1b0   :  { %v1740_v31 = vpop.eup %1739 }
 0x1b1   :  { %v722_v32 = vsel %vm652_vm2, %v1740_v31, 0.0 }
 0x1b2   :  { %723 = vadd.xlane.f32.xlu1 %v722_v32 }
 0x22f   :  { %v703_v33 = vpop.xlane.xlu0 %702 }
 0x230   :  { %1741 = vrcp.f32 %v703_v33 }
 0x233   :  { %v706_v34 = vpop.xlane.xlu1 %705 }
 0x234   :  { %1743 = vrcp.f32 %v706_v34  ;;  %v709_v35 = vpop.xlane.xlu0 %708 }
 0x235   :  { %1745 = vrcp.f32 %v709_v35 }
 0x237   :  { %v712_v36 = vpop.xlane.xlu1 %711 }
 0x238   :  { %1747 = vrcp.f32 %v712_v36  ;;  %v715_v37 = vpop.xlane.xlu0 %714 }
 0x239   :  { %1749 = vrcp.f32 %v715_v37 }
 0x23a   :  { %v1742_v38 = vpop.eup %1741 }
 0x23b   :  { %v733_v39 = vmul.f32 %v1742_v38, %v1726_v12  ;;  %v718_v40 = vpop.xlane.xlu1 %717 }
 0x23c   :  { %1751 = vrcp.f32 %v718_v40  ;;  %v721_v41 = vpop.xlane.xlu0 %720 }
 0x23d   :  { %1753 = vrcp.f32 %v721_v41  ;;  %1680 = vmatmul.mubr.msk.f32.vlgmr.msra.gmra.mrb[8].mxu0 %vm741_vm3, %v733_v39 }
 0x23e   :  { %v1744_v42 = vpop.eup %1743  ;;  %1688 = vmatpush3.msra.mxu0 %v1939_v4  ;;  %1689 = vmatprep.mubr.msk.f32.mxu0 %vm1866_vm0, %v1865_v0 }
 0x23f   :  { %v1746_v43 = vpop.eup %1745  ;;  %v734_v44 = vmul.f32 %v1744_v42, %v1728_v18  ;;  %v724_v45 = vpop.xlane.xlu1 %723  ;;  %1697 = vmatprep.subr.mxu0 %v1865_v0 }
 0x240   :  { %v735_v46 = vmul.f32 %v1746_v43, %v1730_v20  ;;  %1755 = vrcp.f32 %v724_v45 }
 0x241   :  { %1685 = vmatmul.mubr.msk.f32.vlgmr.msra.gmra.mrb[8].mxu1 %vm741_vm3, %v734_v44 }
 0x242   :  { %v1748_v47 = vpop.eup %1747  ;;  %1690 = vmatmul.mubr.msk.f32.vlgmr.msra.gmra.mrb[10].mxu0 %vm741_vm3, %v735_v46  ;;  %1693 = vmatpush3.msra.mxu1 %v1942_v5 }
 0x243   :  { %v1750_v48 = vpop.eup %1749  ;;  %v736_v49 = vmul.f32 %v1748_v47, %v1732_v23  ;;  %1694 = vmatprep.mubr.msk.f32.mxu1 %vm1866_vm0, %v1865_v0  ;;  %1698 = vmatpush3.msra.mxu0 %v1953_v6 }
 0x244   :  { %v737_v4 = vmul.f32 %v1750_v48, %v1734_v24  ;;  %1699 = vmatprep.mubr.msk.f32.mxu0 %vm1866_vm0, %v1865_v0  ;;  %1702 = vmatprep.subr.mxu1 %v1865_v0 }
 0x245   :  { %1695 = vmatmul.mubr.msk.f32.vlgmr.msra.gmra.mrb[10].mxu1 %vm741_vm3, %v736_v49  ;;  %1707 = vmatprep.subr.mxu0 %v1865_v0 }
 0x246   :  { %v1752_v50 = vpop.eup %1751  ;;  %1700 = vmatmul.mubr.msk.f32.vlgmr.msra.gmra.mrb[12].mxu0 %vm741_vm3, %v737_v4  ;;  %1703 = vmatpush3.msra.mxu1 %v1959_v7 }
 0x247   :  { %v1754_v5 = vpop.eup %1753  ;;  %v738_v51 = vmul.f32 %v1752_v50, %v1736_v27  ;;  %1704 = vmatprep.mubr.msk.f32.mxu1 %vm1866_vm0, %v1865_v0  ;;  %1708 = vmatpush3.msra.mxu0 %v1967_v8 }
 0x248   :  { %v739_v6 = vmul.f32 %v1754_v5, %v1738_v28  ;;  %1709 = vmatprep.mubr.msk.f32.mxu0 %vm1866_vm0, %v1865_v0  ;;  %1712 = vmatprep.subr.mxu1 %v1865_v0 }
 0x249   :  { %1705 = vmatmul.mubr.msk.f32.vlgmr.msra.gmra.mrb[12].mxu1 %vm741_vm3, %v738_v51 }
 0x24a   :  { %v1756_v52 = vpop.eup %1755  ;;  %1710 = vmatmul.mubr.msk.f32.vlgmr.msra.gmra.mrb[14].mxu0 %vm741_vm3, %v739_v6  ;;  %1713 = vmatpush3.msra.mxu1 %v1975_v9 }
 0x24b   :  { %v740_v7 = vmul.f32 %v1756_v52, %v1740_v31  ;;  %1714 = vmatprep.mubr.msk.f32.mxu1 %vm1866_vm0, %v1865_v0 }
 0x24d   :  { %1715 = vmatmul.mubr.msk.f32.vlgmr.msra.gmra.mrb[14].mxu1 %vm741_vm3, %v740_v7 }
 0x310   :  { %v811_v8 = vpop.f32.mrb[8].mxu0 }
 0x311   :  { %v1681_v53 = vpop.f32.mrb[9].mxu0  ;;  %v1327_v54 = vsel %vm1326_vm4, %v811_v8, 0.0 }
 0x312   :  { %1328 = vadd.xlane.f32.xlu0 %v1327_v54 }
 0x314   :  { %v884_v55 = vpop.f32.mrb[8].mxu1 }
 0x315   :  { %v957_v56 = vpop.f32.mrb[10].mxu0  ;;  %v1686_v57 = vpop.f32.mrb[9].mxu1  ;;  %v1330_v58 = vsel %vm1326_vm4, %v884_v55, 0.0 }
 0x316   :  { %v1691_v59 = vpop.f32.mrb[11].mxu0  ;;  %1331 = vadd.xlane.f32.xlu1 %v1330_v58  ;;  %v1333_v9 = vsel %vm1326_vm4, %v957_v56, 0.0 }
 0x317   :  { %1334 = vadd.xlane.f32.xlu0 %v1333_v9 }
 0x318   :  { %v1030_v60 = vpop.f32.mrb[10].mxu1 }
 0x319   :  { %v1103_v0 = vpop.f32.mrb[12].mxu0  ;;  %v1696_v61 = vpop.f32.mrb[11].mxu1  ;;  %v1336_v62 = vsel %vm1326_vm4, %v1030_v60, 0.0 }
 0x31a   :  { %v1701_v63 = vpop.f32.mrb[13].mxu0  ;;  %1337 = vadd.xlane.f32.xlu1 %v1336_v62  ;;  %v1339_v1 = vsel %vm1326_vm4, %v1103_v0, 0.0 }
 0x31b   :  { %1340 = vadd.xlane.f32.xlu0 %v1339_v1 }
 0x31c   :  { %v1176_v2 = vpop.f32.mrb[12].mxu1 }
 0x31d   :  { %v1249_v3 = vpop.f32.mrb[14].mxu0  ;;  %v1706_v10 = vpop.f32.mrb[13].mxu1  ;;  %v1342_v11 = vsel %vm1326_vm4, %v1176_v2, 0.0 }
 0x31e   :  { %v1711_v12 = vpop.f32.mrb[15].mxu0  ;;  %1343 = vadd.xlane.f32.xlu1 %v1342_v11  ;;  %v1345_v13 = vsel %vm1326_vm4, %v1249_v3, 0.0 }
 0x31f   :  { %1346 = vadd.xlane.f32.xlu0 %v1345_v13 }
 0x320   :  { %v1322_v14 = vpop.f32.mrb[14].mxu1 }
 0x321   :  { %v1716_v15 = vpop.f32.mrb[15].mxu1  ;;  %v1348_v16 = vsel %vm1326_vm4, %v1322_v14, 0.0 }
 0x322   :  { %1349 = vadd.xlane.f32.xlu1 %v1348_v16 }
 0x39f   :  { %v1329_v17 = vpop.xlane.xlu0 %1328 }
 0x3a0   :  { %v1352_v18 = vmul.f32 0.03125, %v1329_v17 }
 0x3a2   :  { %v2074_v19 = vsub.f32 %v811_v8, %v1352_v18 }
 0x3a3   :  { %v1332_v20 = vpop.xlane.xlu1 %1331 }
 0x3a4   :  { %v1353_v21 = vmul.f32 0.03125, %v1332_v20  ;;  %v1335_v22 = vpop.xlane.xlu0 %1334  ;;  %v1368_v23 = vmul.f32 %v2074_v19, %v2074_v19 }
 0x3a5   :  { %v1354_v24 = vmul.f32 0.03125, %v1335_v22 }
 0x3a6   :  { %v2078_v25 = vsub.f32 %v884_v55, %v1353_v21  ;;  %v1376_v26 = vsel %vm1326_vm4, %v1368_v23, 0.0 }
 0x3a7   :  { %v2081_v27 = vsub.f32 %v957_v56, %v1354_v24  ;;  %v1338_v28 = vpop.xlane.xlu1 %1337  ;;  %1377 = vadd.xlane.f32.xlu0 %v1376_v26 }
 0x3a8   :  { %v1355_v29 = vmul.f32 0.03125, %v1338_v28  ;;  %v1341_v30 = vpop.xlane.xlu0 %1340  ;;  %v1369_v31 = vmul.f32 %v2078_v25, %v2078_v25 }
 0x3a9   :  { %v1356_v32 = vmul.f32 0.03125, %v1341_v30  ;;  %v1370_v33 = vmul.f32 %v2081_v27, %v2081_v27 }
 0x3aa   :  { %v2087_v34 = vsub.f32 %v1030_v60, %v1355_v29  ;;  %v1379_v35 = vsel %vm1326_vm4, %v1369_v31, 0.0 }
 0x3ab   :  { %v2090_v36 = vsub.f32 %v1103_v0, %v1356_v32  ;;  %1380 = vadd.xlane.f32.xlu1 %v1379_v35  ;;  %v1344_v37 = vpop.xlane.xlu1 %1343  ;;  %v1382_v38 = vsel %vm1326_vm4, %v1370_v33, 0.0 }
 0x3ac   :  { %v1357_v39 = vmul.f32 0.03125, %v1344_v37  ;;  %1383 = vadd.xlane.f32.xlu0 %v1382_v38  ;;  %v1347_v40 = vpop.xlane.xlu0 %1346  ;;  %v1371_v41 = vmul.f32 %v2087_v34, %v2087_v34 }
 0x3ad   :  { %v1358_v42 = vmul.f32 0.03125, %v1347_v40  ;;  %v1372_v43 = vmul.f32 %v2090_v36, %v2090_v36 }
 0x3ae   :  { %v2097_v44 = vsub.f32 %v1176_v2, %v1357_v39  ;;  %v1385_v45 = vsel %vm1326_vm4, %v1371_v41, 0.0 }
 0x3af   :  { %v2100_v46 = vsub.f32 %v1249_v3, %v1358_v42  ;;  %1386 = vadd.xlane.f32.xlu1 %v1385_v45  ;;  %v1350_v47 = vpop.xlane.xlu1 %1349  ;;  %v1388_v48 = vsel %vm1326_vm4, %v1372_v43, 0.0 }
 0x3b0   :  { %v1359_v49 = vmul.f32 0.03125, %v1350_v47  ;;  %1389 = vadd.xlane.f32.xlu0 %v1388_v48  ;;  %v1373_v4 = vmul.f32 %v2097_v44, %v2097_v44  ;;  %v1480_v48 = vld [vmem:[%s2166_s1] sm:$0x1] }
 0x3b1   :  { %v1374_v50 = vmul.f32 %v2100_v46, %v2100_v46 }
 0x3b2   :  { %v2107_v5 = vsub.f32 %v1322_v14, %v1359_v49  ;;  %v1391_v51 = vsel %vm1326_vm4, %v1373_v4, 0.0 }
 0x3b3   :  { %1392 = vadd.xlane.f32.xlu1 %v1391_v51  ;;  %v1394_v6 = vsel %vm1326_vm4, %v1374_v50, 0.0 }
 0x3b4   :  { %1395 = vadd.xlane.f32.xlu0 %v1394_v6  ;;  %v1375_v52 = vmul.f32 %v2107_v5, %v2107_v5 }
 0x3b6   :  { %v1397_v7 = vsel %vm1326_vm4, %v1375_v52, 0.0 }
 0x3b7   :  { %1398 = vadd.xlane.f32.xlu1 %v1397_v7 }
 0x434   :  { %v1378_v8 = vpop.xlane.xlu0 %1377 }
 0x435   :  { %v1400_v53 = vmul.f32 0.032258064, %v1378_v8 }
 0x437   :  { %1757 = vrsqrt.f32 %v1400_v53  ;;  %vm1410_vm5 = vcmp.eq.f32.partialorder %v1400_v53, inf  ;;  %v1413_v3 = vand.u32 2147483648, %v1400_v53  ;;  %vm1412_vm6 = vcmp.eq.f32.partialorder %v1400_v53, 0.0 }
 0x438   :  { %v1381_v54 = vpop.xlane.xlu1 %1380 }
 0x439   :  { %v1401_v55 = vmul.f32 0.032258064, %v1381_v54  ;;  %v1384_v56 = vpop.xlane.xlu0 %1383  ;;  %v1481_v54 = vmul.f32 %v1480_v48, %v2074_v19 }
 0x43a   :  { %v1402_v57 = vmul.f32 0.032258064, %v1384_v56 }
 0x43b   :  { %1759 = vrsqrt.f32 %v1401_v55  ;;  %vm1417_vm7 = vcmp.eq.f32.partialorder %v1401_v55, inf  ;;  %vm1419_vm8 = vcmp.eq.f32.partialorder %v1401_v55, 0.0  ;;  %v1420_v18 = vand.u32 2147483648, %v1401_v55 }
 0x43c   :  { %1761 = vrsqrt.f32 %v1402_v57  ;;  %v1387_v58 = vpop.xlane.xlu1 %1386  ;;  %vm1424_vm9 = vcmp.eq.f32.partialorder %v1402_v57, inf  ;;  %v1427_v22 = vand.u32 2147483648, %v1402_v57  ;;  %vm1426_vm10 = vcmp.eq.f32.partialorder %v1402_v57, 0.0 }
 0x43d   :  { %v1403_v59 = vmul.f32 0.032258064, %v1387_v58  ;;  %v1390_v9 = vpop.xlane.xlu0 %1389 }
 0x43e   :  { %v1404_v60 = vmul.f32 0.032258064, %v1390_v9  ;;  %v1867_v9 = vmov 1966171168  }
 0x43f   :  { %1763 = vrsqrt.f32 %v1403_v59  ;;  %vm1431_vm11 = vcmp.eq.f32.partialorder %v1403_v59, inf  ;;  %vm1433_vm12 = vcmp.eq.f32.partialorder %v1403_v59, 0.0  ;;  %v1434_v33 = vand.u32 2147483648, %v1403_v59 }
 0x440   :  { %1765 = vrsqrt.f32 %v1404_v60  ;;  %v1393_v0 = vpop.xlane.xlu1 %1392  ;;  %vm1438_vm13 = vcmp.eq.f32.partialorder %v1404_v60, inf  ;;  %v1441_v38 = vand.u32 2147483648, %v1404_v60  ;;  %vm1440_vm14 = vcmp.eq.f32.partialorder %v1404_v60, 0.0 }
 0x441   :  { %v1758_v61 = vpop.eup %1757  ;;  %v2114_v62 = vmul.f32 0.032258064, %v1393_v0  ;;  %v1396_v63 = vpop.xlane.xlu0 %1395 }
 0x442   :  { %v1409_v1 = vmul.f32 %v1758_v61, %v1400_v53  ;;  %v2116_v2 = vmul.f32 0.032258064, %v1396_v63  ;;  %v1521_v61 = vlaneseq }
 0x443   :  { %1767 = vrsqrt.f32 %v2114_v62  ;;  %vm1445_vm15 = vcmp.eq.f32.partialorder %v2114_v62, inf  ;;  %vm1447_vm0 = vcmp.eq.f32.partialorder %v2114_v62, 0.0  ;;  %v1448_v4 = vand.u32 2147483648, %v2114_v62 }
 0x444   :  { %v1411_v10 = vsel %vm1410_vm5, %v1400_v53, %v1409_v1  ;;  %1769 = vrsqrt.f32 %v2116_v2  ;;  %v1399_v11 = vpop.xlane.xlu1 %1398  ;;  %vm1452_vm2 = vcmp.eq.f32.partialorder %v2116_v2, inf  ;;  %v1455_v6 = vand.u32 2147483648, %v2116_v2 }
 0x445   :  { %v1760_v12 = vpop.eup %1759  ;;  %v1414_v13 = vsel %vm1412_vm6, %v1413_v3, %v1411_v10  ;;  %v2120_v14 = vmul.f32 0.032258064, %v1399_v11  ;;  %vm1454_vm3 = vcmp.eq.f32.partialorder %v2116_v2, 0.0  ;;  %v1497_v3 = vld [vmem:[%s2167_s2] sm:$0x1]  ;;  %v1483_v11 = vmul.f32 %v1480_v48, %v2081_v27  ;;  %s1868_s2 = smov [#allocation7]  }
 0x446   :  { %v1762_v15 = vpop.eup %1761  ;;  %v1464_v16 = vadd.f32 1e-06, %v1414_v13  ;;  %v1416_v17 = vmul.f32 %v1760_v12, %v1401_v55  ;;  %s1571_s11 = sshll.u32 %s1868_s2, 4  ;;  %s1572_s11 = int_to_ptr.vmem [resolvable:$true] %s1571_s11 }
 0x447   :  { %v1423_v20 = vmul.f32 %v1762_v15, %v1402_v57  ;;  %1771 = vrsqrt.f32 %v2120_v14  ;;  %vm1459_vm4 = vcmp.eq.f32.partialorder %v2120_v14, inf  ;;  %vm1461_vm5 = vcmp.eq.f32.partialorder %v2120_v14, 0.0  ;;  %s1833_s12 = scalar_lea.vmem %s1572_s11, 128  ;;  %p1838_p3 = scmp.lt.s32.totalorder %s1572_s11, %s1572_s11 }
 0x448   :  { %1773 = vrcp.f32 %v1464_v16  ;;  %v1418_v21 = vsel %vm1417_vm7, %v1401_v55, %v1416_v17  ;;  %v1522_v15 = vshrl.u32 %v1521_v61, 7  ;;  %p1834_p2 = scmp.ne.s32.totalorder %s1572_s11, %s1833_s12  ;;  %p1839_p4 = scmp.lt.s32.totalorder %s1833_s12, %s1833_s12 }
 0x449   :  { %v1764_v23 = vpop.eup %1763  ;;  %v1421_v24 = vsel %vm1419_vm8, %v1420_v18, %v1418_v21  ;;  %v1425_v26 = vsel %vm1424_vm9, %v1402_v57, %v1423_v20  ;;  %v1485_v21 = vmul.f32 %v1480_v48, %v2090_v36 }
 0x44a   :  { %v1766_v28 = vpop.eup %1765  ;;  %v1465_v29 = vadd.f32 1e-06, %v1421_v24  ;;  %v1428_v30 = vsel %vm1426_vm10, %v1427_v22, %v1425_v26  ;;  %v1430_v31 = vmul.f32 %v1764_v23, %v1403_v59  ;;  %v1486_v26 = vmul.f32 %v1480_v48, %v2097_v44  ;;  %p1840_p5 = por %p1839_p4, %p1838_p3 }
 0x44b   :  { %v1466_v32 = vadd.f32 1e-06, %v1428_v30  ;;  %v1437_v35 = vmul.f32 %v1766_v28, %v1404_v60 }
 0x44c   :  { %1775 = vrcp.f32 %v1465_v29  ;;  %v1432_v37 = vsel %vm1431_vm11, %v1403_v59, %v1430_v31  ;;  %v1462_v59 = vand.u32 2147483648, %v2120_v14  ;;  %p1841_p6 = pnand %p1840_p5, %p1834_p2 }
 0x44d   :  { %v1768_v39 = vpop.eup %1767  ;;  %1777 = vrcp.f32 %v1466_v32  ;;  %v1435_v40 = vsel %vm1433_vm12, %v1434_v33, %v1432_v37  ;;  %v1439_v41 = vsel %vm1438_vm13, %v1404_v60, %v1437_v35  ;;  %v1519_v60 = vunpack.c.l.s4 %v1867_v9 }
 0x44e   :  { %v1770_v42 = vpop.eup %1769  ;;  %v1467_v43 = vadd.f32 1e-06, %v1435_v40  ;;  %v1442_v45 = vsel %vm1440_vm14, %v1441_v38, %v1439_v41  ;;  %v1444_v47 = vmul.f32 %v1768_v39, %v2114_v62  ;;  %v1487_v32 = vmul.f32 %v1480_v48, %v2100_v46 }
 0x44f   :  { %v1468_v49 = vadd.f32 1e-06, %v1442_v45  ;;  %v1451_v50 = vmul.f32 %v1770_v42, %v2116_v2  ;;  %v1520_v13 = vunpack.c.0.s8 %v1519_v60  ;;  %v1488_v35 = vmul.f32 %v1480_v48, %v2107_v5 }
 0x450   :  { %1779 = vrcp.f32 %v1467_v43  ;;  %v1446_v51 = vsel %vm1445_vm15, %v2114_v62, %v1444_v47  ;;  %v1482_v62 = vmul.f32 %v1480_v48, %v2078_v25 }
 0x451   :  { %v1772_v52 = vpop.eup %1771  ;;  %1781 = vrcp.f32 %v1468_v49  ;;  %v1449_v7 = vsel %vm1447_vm0, %v1448_v4, %v1446_v51  ;;  %v1453_v8 = vsel %vm1452_vm2, %v2116_v2, %v1451_v50  ;;  %v1523_v24 = vsub.s32 %v1520_v13, %v1522_v15 }
 0x452   :  { %v1774_v53 = vpop.eup %1773  ;;  %v1469_v55 = vadd.f32 1e-06, %v1449_v7  ;;  %v1456_v56 = vsel %vm1454_vm3, %v1455_v6, %v1453_v8  ;;  %v1458_v57 = vmul.f32 %v1772_v52, %v2120_v14 }
 0x453   :  { %v1470_v58 = vadd.f32 1e-06, %v1456_v56  ;;  %v1489_v63 = vmul.f32 %v1774_v53, %v1481_v54 }
 0x454   :  { %1783 = vrcp.f32 %v1469_v55  ;;  %v1460_v0 = vsel %vm1459_vm4, %v2120_v14, %v1458_v57  ;;  %v1484_v14 = vmul.f32 %v1480_v48, %v2087_v34 }
 0x455   :  { %1785 = vrcp.f32 %v1470_v58  ;;  %v1463_v19 = vsel %vm1461_vm5, %v1462_v59, %v1460_v0  ;;  %v1498_v25 = vadd.f32 %v1497_v3, %v1489_v63 }
 0x456   :  { %v1776_v1 = vpop.eup %1775  ;;  %v1471_v2 = vadd.f32 1e-06, %v1463_v19 }
 0x457   :  { %v1778_v10 = vpop.eup %1777  ;;  %v1490_v12 = vmul.f32 %v1776_v1, %v1482_v62 }
 0x458   :  { %1787 = vrcp.f32 %v1471_v2  ;;  %v1491_v16 = vmul.f32 %v1778_v10, %v1483_v11 }
 0x459   :  { %v1499_v17 = vadd.f32 %v1497_v3, %v1490_v12 }
 0x45a   :  { %v1780_v18 = vpop.eup %1779  ;;  %v1500_v27 = vadd.f32 %v1497_v3, %v1491_v16 }
 0x45b   :  { %v1782_v20 = vpop.eup %1781  ;;  %v1492_v22 = vmul.f32 %v1780_v18, %v1484_v14  ;;  %v1514_v23 = vcombine.low %v1498_v25, %v1499_v17 }
 0x45c   :  { %v1493_v28 = vmul.f32 %v1782_v20, %v1485_v21 }
 0x45d   :  { %v1501_v29 = vadd.f32 %v1497_v3, %v1492_v22  ;;  %v1524_v37 = vrot.slane %v1514_v23, %v1523_v24 }
 0x45e   :  { %v1784_v30 = vpop.eup %1783  ;;  %v1502_v39 = vadd.f32 %v1497_v3, %v1493_v28 }
 0x45f   :  { %v1786_v31 = vpop.eup %1785  ;;  %v1494_v34 = vmul.f32 %v1784_v30, %v1486_v26  ;;  %v1515_v33 = vcombine.low %v1500_v27, %v1501_v29 }
 0x460   :  { %v1495_v38 = vmul.f32 %v1786_v31, %v1487_v32 }
 0x461   :  { %v1503_v36 = vadd.f32 %v1497_v3, %v1494_v34  ;;  %v1531_v40 = vrot.slane %v1515_v33, %v1523_v24 }
 0x462   :  { %v1788_v41 = vpop.eup %1787  ;;  %v1504_v45 = vadd.f32 %v1497_v3, %v1495_v38 }
 0x463   :  { %v1496_v42 = vmul.f32 %v1788_v41, %v1488_v35  ;;  %v1516_v43 = vcombine.low %v1502_v39, %v1503_v36  ;;  %v1546_v44 = vcombine.low %v1524_v37, %v1531_v40 }
 0x465   :  { %v1505_v47 = vadd.f32 %v1497_v3, %v1496_v42  ;;  %v1538_v4 = vrot.slane %v1516_v43, %v1523_v24  ;;  %v1554_v46 = vrot.slane %v1546_v44, %v1523_v24 }
 0x467   :  { %v1517_v49 = vcombine.low %v1504_v45, %v1505_v47 }
 0x469   :  { %v1545_v50 = vrot.slane %v1517_v49, %v1523_v24 }
 0x46b   :  { %v1547_v51 = vcombine.low %v1538_v4, %v1545_v50 }
 0x46d   :  { %v1561_v6 = vrot.slane %v1547_v51, %v1523_v24 }
 0x46f   :  { %v1562_v5 = vcombine.low %v1554_v46, %v1561_v6 }
 0x471   :  { %1564 = vst.msk [vmem:[#allocation7] sm:$0xff] %vm64_vm1, %v1562_v5 }
 0x472   :  { %1844 = shalt.err (!%p1841_p6)
}
 0x473   :  { %s1845_s15 = scalar_lea.hbm %s2170_s5, 128 }
 0x474   :  { %p1846_p7 = scmp.ne.s32.totalorder %s2170_s5, %s1845_s15  ;;  %p1849_p8 = scmp.lt.u32.totalorder %s1845_s15, %s2170_s5 }
 0x476   :  { %p1851_p9 = pnand %p1849_p8, %p1846_p7 }
 0x478   :  { %1854 = shalt.err (!%p1851_p9)
}
 0x479   :  { %1574 = dma.vmem_to_hbm [thread:$0]  %s1572_s11, 128, %s2170_s5, [#allocation4]  }
 0x47a   :  { %1859 = dma.done.wait [#allocation4], 128  }
 0x47b   :  { %1860 = vsyncadd [#allocation4], 4294967168 }
 0x47c   :  { %1578 = vsyncpa [#allocation3], 1 }
 0x47d   :  { %1579 = vsyncpa [#allocation6], 1 }
 0x47e   :  { %1580 = vsyncpa [#allocation4], 1 }

</bundles_post_ra>
